<compile_context>
chip_gen: v7x
topology: tpu7x:2x2x1
jax: 0.10.0
libtpu: 0.0.40
codegen_flags: <defaults>
</compile_context>

<pallas_src>
import numpy as np
import jax
import jax.numpy as jnp
from jax import lax
from jax.experimental import pallas as pl
from jax.experimental.pallas import tpu as pltpu

BN_EPS = 1e-5


# ----------------------------- fused Pallas kernel -----------------------------

def _silu(y):
    # SiLU with an EUP-friendly sigmoid: sigmoid(y) = 0.5*(1 + tanh(y/2)).
    # tanh runs on the EUP slot; no VPU divide, exact in f32.
    return y * (0.5 * jnp.tanh(0.5 * y) + 0.5)


def _make_fused_kernel(n_blocks, H, W, dim_conv):
    """Whole FasterNeXt forward for one image; every activation is a (C, H*W) slab in VMEM."""
    HW = H * W
    taps = [(dh, dw) for dh in range(3) for dw in range(3)]  # dh outer, dw inner

    def kernel(*refs):
        o_ref = refs[-1]
        it = iter(refs[:-1])
        x_ref, mask_ref = next(it), next(it)
        cv1_w, cv1_b, cv2_w, cv2_b = next(it), next(it), next(it), next(it)
        blocks = [tuple(next(it) for _ in range(5)) for _ in range(n_blocks)]
        cv3_w, cv3_b = next(it), next(it)

        def pw_silu(z, w_ref, b_ref):
            # 1x1 Conv with BN pre-folded into (w, b): (Cout,Cin) @ (Cin,HW) on the MXU,
            # bias add, SiLU.  HW is lane-dense.
            y = jnp.dot(w_ref[...], z, preferred_element_type=jnp.float32) + b_ref[...]
            return _silu(y)

        x = x_ref[0]                 # (c1, HW): channels on sublanes, pixels on lanes
        mask = mask_ref[...]         # (9, HW): SAME-padding validity masks for the 3x3 taps

        a = pw_silu(x, cv1_w, cv1_b)     # FasterNeXt.cv1
        b = pw_silu(x, cv2_w, cv2_b)     # FasterNeXt.cv2

        for pconv_w, bw2, bb2, bw3, bb3 in blocks:           # FasterNetBlocks
            # --- PConv (forward_split_cat): 3x3 conv on the first dim_conv channels ---
            a1 = a[:dim_conv, :]
            a2 = a[dim_conv:, :]
            cols = []
            for t, (dh, dw) in enumerate(taps):
                off = (dh - 1) * W + (dw - 1)                # flattened spatial offset
                if off == 0:
                    cols.append(a1)                          # center tap, no shift/mask
                else:
                    # spatial shift = lane rotation (XLU) + zero-padding mask
                    tap = pltpu.roll(a1, shift=(-off) % HW, axis=1)
                    cols.append(tap * mask[t:t + 1, :])
            col = jnp.concatenate(cols, axis=0)              # in-VMEM im2col: (9*dim_conv, HW)
            y1 = jnp.dot(pconv_w[...], col,                  # ONE MXU matmul, K = 9*dim_conv
                         preferred_element_type=jnp.float32)
            y = jnp.concatenate([y1, a2], axis=0) if a2.shape[0] else y1
            # --- block cv2, cv3 (+ residual fused, never leaves VMEM) ---
            y = pw_silu(y, bw2, bb2)
            a = pw_silu(y, bw3, bb3) + a

        cat = jnp.concatenate([a, b], axis=0)                # (2*c_, HW)
        o_ref[0] = pw_silu(cat, cv3_w, cv3_b).astype(o_ref.dtype)   # FasterNeXt.cv3

    return kernel


# ----------------------------- wrapper (folding + layout glue) -----------------------------

def _fold_bn(p):
    scale = p["gamma"] / jnp.sqrt(p["var"] + BN_EPS)
    bias = p["beta"] - p["mean"] * scale
    return scale, bias


def _fold_pw(p):
    """Fold BN scale into the 1x1 conv weight: returns (Cout, Cin) weight and (Cout, 1) bias."""
    scale, bias = _fold_bn(p)
    wf = (p["w"] * scale[None, :]).T          # (Cout, Cin)
    return wf, bias[:, None]


def _pconv_im2col_weight(w3x3):
    """(3,3,Cin,Cout) HWIO -> (Cout, 9*Cin), matching the in-kernel tap/channel ordering."""
    cout = w3x3.shape[3]
    return jnp.transpose(w3x3, (3, 0, 1, 2)).reshape(cout, -1)


def _tap_masks(H, W):
    """(9, H*W) f32 validity masks for the 3x3 SAME-padding taps (dh outer, dw inner)."""
    h = np.arange(H)[:, None]
    w = np.arange(W)[None, :]
    rows = []
    for dh in range(3):
        for dw in range(3):
            ok = ((h + dh - 1 >= 0) & (h + dh - 1 < H) &
                  (w + dw - 1 >= 0) & (w + dw - 1 < W))
            rows.append(ok.reshape(-1))
    return jnp.asarray(np.stack(rows).astype(np.float32))


def fasternext_forward(x_nchw, params):
    """FasterNeXt forward, NCHW in / NCHW out, as a single fused Pallas call."""
    N, c1, H, W = x_nchw.shape
    HW = H * W
    c2 = params["cv3"]["w"].shape[1]
    n_blocks = len(params["blocks"])
    dim_conv = params["blocks"][0]["pconv_w"].shape[2] if n_blocks else 1

    # One-time (host/XLA side) weight folding.
    cv1_w, cv1_b = _fold_pw(params["cv1"])
    cv2_w, cv2_b = _fold_pw(params["cv2"])
    cv3_w, cv3_b = _fold_pw(params["cv3"])
    blk_args = []
    for bp in params["blocks"]:
        bw2, bb2 = _fold_pw(bp["cv2"])
        bw3, bb3 = _fold_pw(bp["cv3"])
        blk_args += [_pconv_im2col_weight(bp["pconv_w"]), bw2, bb2, bw3, bb3]

    # NCHW reshapes directly to (N, C, H*W): pixels land on the lane axis, no transpose needed.
    x3 = x_nchw.reshape(N, c1, HW)
    mask = _tap_masks(H, W)

    args = [x3, mask, cv1_w, cv1_b, cv2_w, cv2_b] + blk_args + [cv3_w, cv3_b]

    def _const_spec(a):
        nd = a.ndim
        return pl.BlockSpec(a.shape, lambda n, _nd=nd: (0,) * _nd)   # DMA once, VMEM-resident

    in_specs = ([pl.BlockSpec((1, c1, HW), lambda n: (n, 0, 0))] +
                [_const_spec(a) for a in args[1:]])

    out = pl.pallas_call(
        _make_fused_kernel(n_blocks, H, W, dim_conv),
        out_shape=jax.ShapeDtypeStruct((N, c2, HW), x_nchw.dtype),
        grid=(N,),   # one image / grid step; "parallel" lets v7x shard across its 2 TensorCores
        in_specs=in_specs,
        out_specs=pl.BlockSpec((1, c2, HW), lambda n: (n, 0, 0)),
        compiler_params=pltpu.CompilerParams(dimension_semantics=("parallel",)),
    )(*args)
    return out.reshape(N, c2, H, W)


# ----------------------------- deterministic params -----------------------------

def _init_conv_bn(key, cin, cout):
    k1, k2, k3, k4, k5 = jax.random.split(key, 5)
    return dict(
        w=0.1 * jax.random.normal(k1, (cin, cout), jnp.float32),
        gamma=1.0 + 0.1 * jax.random.normal(k2, (cout,), jnp.float32),
        beta=0.05 * jax.random.normal(k3, (cout,), jnp.float32),
        mean=0.1 * jax.random.normal(k4, (cout,), jnp.float32),
        var=0.5 + 0.1 * jnp.abs(jax.random.normal(k5, (cout,), jnp.float32)),
    )


def make_params(key, c1, c2, n=1, e=0.5):
    c_ = int(c2 * e)
    keys = jax.random.split(key, 3 + n)
    params = dict(
        cv1=_init_conv_bn(keys[0], c1, c_),
        cv2=_init_conv_bn(keys[1], c1, c_),
        cv3=_init_conv_bn(keys[2], 2 * c_, c2),
        blocks=[],
    )
    for i in range(n):
        bk = jax.random.split(keys[3 + i], 3)
        dim_conv = c_ // 2           # PConv(c_, n_div=2)
        ce = int(c_ * 1.0)           # FasterNetBlock uses e=1.0
        params["blocks"].append(dict(
            pconv_w=0.1 * jax.random.normal(bk[0], (3, 3, dim_conv, dim_conv), jnp.float32),
            cv2=_init_conv_bn(bk[1], c_, ce),
            cv3=_init_conv_bn(bk[2], ce, c_),
        ))
    return params


# ----------------------------- pure-JAX reference -----------------------------

def _ref_conv_bn_silu(x, p, residual=None):
    scale, bias = _fold_bn(p)
    y = jnp.einsum("nhwc,co->nhwo", x, p["w"],
                   precision=lax.Precision.HIGHEST) * scale + bias
    y = y * jax.nn.sigmoid(y)
    if residual is not None:
        y = y + residual
    return y


def ref_forward(x_nchw, params):
    x = jnp.transpose(x_nchw, (0, 2, 3, 1))
    a = _ref_conv_bn_silu(x, params["cv1"])
    b = _ref_conv_bn_silu(x, params["cv2"])
    for bp in params["blocks"]:
        dim_conv = bp["pconv_w"].shape[2]
        x1, x2 = a[..., :dim_conv], a[..., dim_conv:]
        y1 = lax.conv_general_dilated(
            x1, bp["pconv_w"], (1, 1), "SAME",
            dimension_numbers=("NHWC", "HWIO", "NHWC"),
            precision=lax.Precision.HIGHEST)
        y = jnp.concatenate([y1, x2], axis=-1)
        y = _ref_conv_bn_silu(y, bp["cv2"])
        a = _ref_conv_bn_silu(y, bp["cv3"], residual=a)
    out = _ref_conv_bn_silu(jnp.concatenate([a, b], axis=-1), params["cv3"])
    return jnp.transpose(out, (0, 3, 1, 2))


# ----------------------------- main -----------------------------

if __name__ == "__main__":
    key = jax.random.PRNGKey(0)
    kx, kp = jax.random.split(key)

    # FasterNeXt(c1=8, c2=8, n=1, shortcut=True, g=1, e=0.5); input NCHW.
    c1, c2, n = 8, 8, 1
    N, H, W = 2, 16, 16
    x = jax.random.normal(kx, (N, c1, H, W), jnp.float32)
    params = make_params(kp, c1, c2, n=n, e=0.5)

    fwd = jax.jit(fasternext_forward)
    out = jax.block_until_ready(fwd(x, params))

    ref = jax.block_until_ready(ref_forward(x, params))
    assert out.shape == (N, c2, H, W) and out.dtype == jnp.float32
    # f32 everywhere (exact tanh-based SiLU) -> tolerance tightened vs. the previous 3e-2.
    np.testing.assert_allclose(np.asarray(out), np.asarray(ref), rtol=1e-2, atol=1e-2)

    print("KERNEL_OK")
</pallas_src>

<mosaic_0001>
module attributes {stable_mosaic.version = 11 : i64} {
  func.func @kernel(%arg0: i32, %arg1: memref<1x8x256xf32, #tpu.memory_space<vmem>>, %arg2: memref<9x256xf32, #tpu.memory_space<vmem>>, %arg3: memref<4x8xf32, #tpu.memory_space<vmem>>, %arg4: memref<4x1xf32, #tpu.memory_space<vmem>>, %arg5: memref<4x8xf32, #tpu.memory_space<vmem>>, %arg6: memref<4x1xf32, #tpu.memory_space<vmem>>, %arg7: memref<2x18xf32, #tpu.memory_space<vmem>>, %arg8: memref<4x4xf32, #tpu.memory_space<vmem>>, %arg9: memref<4x1xf32, #tpu.memory_space<vmem>>, %arg10: memref<4x4xf32, #tpu.memory_space<vmem>>, %arg11: memref<4x1xf32, #tpu.memory_space<vmem>>, %arg12: memref<8x8xf32, #tpu.memory_space<vmem>>, %arg13: memref<8x1xf32, #tpu.memory_space<vmem>>, %arg14: memref<1x8x256xf32, #tpu.memory_space<vmem>>) attributes {dimension_semantics = [#tpu.dimension_semantics<parallel>], iteration_bounds = array<i64: 2>, scalar_prefetch = 0 : i64, scratch_operands = 0 : i64, tpu.core_type = #tpu.core_type<tc>, window_params = [{transform_indices = @transform_0, window_bounds = array<i64: 1, 8, 256>}, {pipeline_mode = #tpu.pipeline_mode<synchronous>, transform_indices = @transform_1, window_bounds = array<i64: 9, 256>}, {pipeline_mode = #tpu.pipeline_mode<synchronous>, transform_indices = @transform_2, window_bounds = array<i64: 4, 8>}, {pipeline_mode = #tpu.pipeline_mode<synchronous>, transform_indices = @transform_3, window_bounds = array<i64: 4, 1>}, {pipeline_mode = #tpu.pipeline_mode<synchronous>, transform_indices = @transform_4, window_bounds = array<i64: 4, 8>}, {pipeline_mode = #tpu.pipeline_mode<synchronous>, transform_indices = @transform_5, window_bounds = array<i64: 4, 1>}, {pipeline_mode = #tpu.pipeline_mode<synchronous>, transform_indices = @transform_6, window_bounds = array<i64: 2, 18>}, {pipeline_mode = #tpu.pipeline_mode<synchronous>, transform_indices = @transform_7, window_bounds = array<i64: 4, 4>}, {pipeline_mode = #tpu.pipeline_mode<synchronous>, transform_indices = @transform_8, window_bounds = array<i64: 4, 1>}, {pipeline_mode = #tpu.pipeline_mode<synchronous>, transform_indices = @transform_9, window_bounds = array<i64: 4, 4>}, {pipeline_mode = #tpu.pipeline_mode<synchronous>, transform_indices = @transform_10, window_bounds = array<i64: 4, 1>}, {pipeline_mode = #tpu.pipeline_mode<synchronous>, transform_indices = @transform_11, window_bounds = array<i64: 8, 8>}, {pipeline_mode = #tpu.pipeline_mode<synchronous>, transform_indices = @transform_12, window_bounds = array<i64: 8, 1>}, {transform_indices = @transform_13, window_bounds = array<i64: 1, 8, 256>}]} {
    %c0 = arith.constant 0 : index
    %c0_0 = arith.constant 0 : index
    %c0_1 = arith.constant 0 : index
    %0 = vector.load %arg1[%c0, %c0_0, %c0_1] : memref<1x8x256xf32, #tpu.memory_space<vmem>>, vector<1x8x256xf32>
    %1 = vector.shape_cast %0 : vector<1x8x256xf32> to vector<8x256xf32>
    %c0_2 = arith.constant 0 : index
    %c0_3 = arith.constant 0 : index
    %2 = vector.load %arg2[%c0_2, %c0_3] : memref<9x256xf32, #tpu.memory_space<vmem>>, vector<9x256xf32>
    %c0_4 = arith.constant 0 : index
    %c0_5 = arith.constant 0 : index
    %3 = vector.load %arg3[%c0_4, %c0_5] : memref<4x8xf32, #tpu.memory_space<vmem>>, vector<4x8xf32>
    %cst = arith.constant dense<0.000000e+00> : vector<4x256xf32>
    %4 = tpu.matmul %3, %1, %cst {dimension_numbers = #tpu.dot_dimension_numbers<[1], [0], [0], [1], [0, 0, 1, 1], [], []>} : vector<4x8xf32>, vector<8x256xf32>, vector<4x256xf32> -> vector<4x256xf32>
    %c0_6 = arith.constant 0 : index
    %c0_7 = arith.constant 0 : index
    %5 = vector.load %arg4[%c0_6, %c0_7] : memref<4x1xf32, #tpu.memory_space<vmem>>, vector<4x1xf32>
    %6 = vector.broadcast %5 : vector<4x1xf32> to vector<4x256xf32>
    %7 = arith.addf %4, %6 : vector<4x256xf32>
    %cst_8 = arith.constant 5.000000e-01 : f32
    %8 = vector.broadcast %cst_8 : f32 to vector<4x256xf32>
    %9 = arith.mulf %8, %7 : vector<4x256xf32>
    %10 = math.tanh %9 : vector<4x256xf32>
    %cst_9 = arith.constant 5.000000e-01 : f32
    %11 = vector.broadcast %cst_9 : f32 to vector<4x256xf32>
    %12 = arith.mulf %11, %10 : vector<4x256xf32>
    %cst_10 = arith.constant 5.000000e-01 : f32
    %13 = vector.broadcast %cst_10 : f32 to vector<4x256xf32>
    %14 = arith.addf %12, %13 : vector<4x256xf32>
    %15 = arith.mulf %7, %14 : vector<4x256xf32>
    %c0_11 = arith.constant 0 : index
    %c0_12 = arith.constant 0 : index
    %16 = vector.load %arg5[%c0_11, %c0_12] : memref<4x8xf32, #tpu.memory_space<vmem>>, vector<4x8xf32>
    %cst_13 = arith.constant dense<0.000000e+00> : vector<4x256xf32>
    %17 = tpu.matmul %16, %1, %cst_13 {dimension_numbers = #tpu.dot_dimension_numbers<[1], [0], [0], [1], [0, 0, 1, 1], [], []>} : vector<4x8xf32>, vector<8x256xf32>, vector<4x256xf32> -> vector<4x256xf32>
    %c0_14 = arith.constant 0 : index
    %c0_15 = arith.constant 0 : index
    %18 = vector.load %arg6[%c0_14, %c0_15] : memref<4x1xf32, #tpu.memory_space<vmem>>, vector<4x1xf32>
    %19 = vector.broadcast %18 : vector<4x1xf32> to vector<4x256xf32>
    %20 = arith.addf %17, %19 : vector<4x256xf32>
    %cst_16 = arith.constant 5.000000e-01 : f32
    %21 = vector.broadcast %cst_16 : f32 to vector<4x256xf32>
    %22 = arith.mulf %21, %20 : vector<4x256xf32>
    %23 = math.tanh %22 : vector<4x256xf32>
    %cst_17 = arith.constant 5.000000e-01 : f32
    %24 = vector.broadcast %cst_17 : f32 to vector<4x256xf32>
    %25 = arith.mulf %24, %23 : vector<4x256xf32>
    %cst_18 = arith.constant 5.000000e-01 : f32
    %26 = vector.broadcast %cst_18 : f32 to vector<4x256xf32>
    %27 = arith.addf %25, %26 : vector<4x256xf32>
    %28 = arith.mulf %20, %27 : vector<4x256xf32>
    %29 = vector.extract_strided_slice %15 {offsets = [0, 0], sizes = [2, 256], strides = [1, 1]} : vector<4x256xf32> to vector<2x256xf32>
    %30 = vector.extract_strided_slice %15 {offsets = [2, 0], sizes = [2, 256], strides = [1, 1]} : vector<4x256xf32> to vector<2x256xf32>
    %c17_i32 = arith.constant 17 : i32
    %31 = tpu.dynamic_rotate %29 by %c17_i32 dim 1 : vector<2x256xf32>, i32 -> vector<2x256xf32>
    %32 = vector.extract_strided_slice %2 {offsets = [0, 0], sizes = [1, 256], strides = [1, 1]} : vector<9x256xf32> to vector<1x256xf32>
    %33 = vector.broadcast %32 : vector<1x256xf32> to vector<2x256xf32>
    %34 = arith.mulf %31, %33 : vector<2x256xf32>
    %c16_i32 = arith.constant 16 : i32
    %35 = tpu.dynamic_rotate %29 by %c16_i32 dim 1 : vector<2x256xf32>, i32 -> vector<2x256xf32>
    %36 = vector.extract_strided_slice %2 {offsets = [1, 0], sizes = [1, 256], strides = [1, 1]} : vector<9x256xf32> to vector<1x256xf32>
    %37 = vector.broadcast %36 : vector<1x256xf32> to vector<2x256xf32>
    %38 = arith.mulf %35, %37 : vector<2x256xf32>
    %c15_i32 = arith.constant 15 : i32
    %39 = tpu.dynamic_rotate %29 by %c15_i32 dim 1 : vector<2x256xf32>, i32 -> vector<2x256xf32>
    %40 = vector.extract_strided_slice %2 {offsets = [2, 0], sizes = [1, 256], strides = [1, 1]} : vector<9x256xf32> to vector<1x256xf32>
    %41 = vector.broadcast %40 : vector<1x256xf32> to vector<2x256xf32>
    %42 = arith.mulf %39, %41 : vector<2x256xf32>
    %c1_i32 = arith.constant 1 : i32
    %43 = tpu.dynamic_rotate %29 by %c1_i32 dim 1 : vector<2x256xf32>, i32 -> vector<2x256xf32>
    %44 = vector.extract_strided_slice %2 {offsets = [3, 0], sizes = [1, 256], strides = [1, 1]} : vector<9x256xf32> to vector<1x256xf32>
    %45 = vector.broadcast %44 : vector<1x256xf32> to vector<2x256xf32>
    %46 = arith.mulf %43, %45 : vector<2x256xf32>
    %c255_i32 = arith.constant 255 : i32
    %47 = tpu.dynamic_rotate %29 by %c255_i32 dim 1 : vector<2x256xf32>, i32 -> vector<2x256xf32>
    %48 = vector.extract_strided_slice %2 {offsets = [5, 0], sizes = [1, 256], strides = [1, 1]} : vector<9x256xf32> to vector<1x256xf32>
    %49 = vector.broadcast %48 : vector<1x256xf32> to vector<2x256xf32>
    %50 = arith.mulf %47, %49 : vector<2x256xf32>
    %c241_i32 = arith.constant 241 : i32
    %51 = tpu.dynamic_rotate %29 by %c241_i32 dim 1 : vector<2x256xf32>, i32 -> vector<2x256xf32>
    %52 = vector.extract_strided_slice %2 {offsets = [6, 0], sizes = [1, 256], strides = [1, 1]} : vector<9x256xf32> to vector<1x256xf32>
    %53 = vector.broadcast %52 : vector<1x256xf32> to vector<2x256xf32>
    %54 = arith.mulf %51, %53 : vector<2x256xf32>
    %c240_i32 = arith.constant 240 : i32
    %55 = tpu.dynamic_rotate %29 by %c240_i32 dim 1 : vector<2x256xf32>, i32 -> vector<2x256xf32>
    %56 = vector.extract_strided_slice %2 {offsets = [7, 0], sizes = [1, 256], strides = [1, 1]} : vector<9x256xf32> to vector<1x256xf32>
    %57 = vector.broadcast %56 : vector<1x256xf32> to vector<2x256xf32>
    %58 = arith.mulf %55, %57 : vector<2x256xf32>
    %c239_i32 = arith.constant 239 : i32
    %59 = tpu.dynamic_rotate %29 by %c239_i32 dim 1 : vector<2x256xf32>, i32 -> vector<2x256xf32>
    %60 = vector.extract_strided_slice %2 {offsets = [8, 0], sizes = [1, 256], strides = [1, 1]} : vector<9x256xf32> to vector<1x256xf32>
    %61 = vector.broadcast %60 : vector<1x256xf32> to vector<2x256xf32>
    %62 = arith.mulf %59, %61 : vector<2x256xf32>
    %63 = tpu.concatenate %34, %38, %42, %46, %29, %50, %54, %58, %62 in 0 : vector<2x256xf32>, vector<2x256xf32>, vector<2x256xf32>, vector<2x256xf32>, vector<2x256xf32>, vector<2x256xf32>, vector<2x256xf32>, vector<2x256xf32>, vector<2x256xf32> -> vector<18x256xf32>
    %c0_19 = arith.constant 0 : index
    %c0_20 = arith.constant 0 : index
    %64 = vector.load %arg7[%c0_19, %c0_20] : memref<2x18xf32, #tpu.memory_space<vmem>>, vector<2x18xf32>
    %cst_21 = arith.constant dense<0.000000e+00> : vector<2x256xf32>
    %65 = tpu.matmul %64, %63, %cst_21 {dimension_numbers = #tpu.dot_dimension_numbers<[1], [0], [0], [1], [0, 0, 1, 1], [], []>} : vector<2x18xf32>, vector<18x256xf32>, vector<2x256xf32> -> vector<2x256xf32>
    %66 = tpu.concatenate %65, %30 in 0 : vector<2x256xf32>, vector<2x256xf32> -> vector<4x256xf32>
    %c0_22 = arith.constant 0 : index
    %c0_23 = arith.constant 0 : index
    %67 = vector.load %arg8[%c0_22, %c0_23] : memref<4x4xf32, #tpu.memory_space<vmem>>, vector<4x4xf32>
    %cst_24 = arith.constant dense<0.000000e+00> : vector<4x256xf32>
    %68 = tpu.matmul %67, %66, %cst_24 {dimension_numbers = #tpu.dot_dimension_numbers<[1], [0], [0], [1], [0, 0, 1, 1], [], []>} : vector<4x4xf32>, vector<4x256xf32>, vector<4x256xf32> -> vector<4x256xf32>
    %c0_25 = arith.constant 0 : index
    %c0_26 = arith.constant 0 : index
    %69 = vector.load %arg9[%c0_25, %c0_26] : memref<4x1xf32, #tpu.memory_space<vmem>>, vector<4x1xf32>
    %70 = vector.broadcast %69 : vector<4x1xf32> to vector<4x256xf32>
    %71 = arith.addf %68, %70 : vector<4x256xf32>
    %cst_27 = arith.constant 5.000000e-01 : f32
    %72 = vector.broadcast %cst_27 : f32 to vector<4x256xf32>
    %73 = arith.mulf %72, %71 : vector<4x256xf32>
    %74 = math.tanh %73 : vector<4x256xf32>
    %cst_28 = arith.constant 5.000000e-01 : f32
    %75 = vector.broadcast %cst_28 : f32 to vector<4x256xf32>
    %76 = arith.mulf %75, %74 : vector<4x256xf32>
    %cst_29 = arith.constant 5.000000e-01 : f32
    %77 = vector.broadcast %cst_29 : f32 to vector<4x256xf32>
    %78 = arith.addf %76, %77 : vector<4x256xf32>
    %79 = arith.mulf %71, %78 : vector<4x256xf32>
    %c0_30 = arith.constant 0 : index
    %c0_31 = arith.constant 0 : index
    %80 = vector.load %arg10[%c0_30, %c0_31] : memref<4x4xf32, #tpu.memory_space<vmem>>, vector<4x4xf32>
    %cst_32 = arith.constant dense<0.000000e+00> : vector<4x256xf32>
    %81 = tpu.matmul %80, %79, %cst_32 {dimension_numbers = #tpu.dot_dimension_numbers<[1], [0], [0], [1], [0, 0, 1, 1], [], []>} : vector<4x4xf32>, vector<4x256xf32>, vector<4x256xf32> -> vector<4x256xf32>
    %c0_33 = arith.constant 0 : index
    %c0_34 = arith.constant 0 : index
    %82 = vector.load %arg11[%c0_33, %c0_34] : memref<4x1xf32, #tpu.memory_space<vmem>>, vector<4x1xf32>
    %83 = vector.broadcast %82 : vector<4x1xf32> to vector<4x256xf32>
    %84 = arith.addf %81, %83 : vector<4x256xf32>
    %cst_35 = arith.constant 5.000000e-01 : f32
    %85 = vector.broadcast %cst_35 : f32 to vector<4x256xf32>
    %86 = arith.mulf %85, %84 : vector<4x256xf32>
    %87 = math.tanh %86 : vector<4x256xf32>
    %cst_36 = arith.constant 5.000000e-01 : f32
    %88 = vector.broadcast %cst_36 : f32 to vector<4x256xf32>
    %89 = arith.mulf %88, %87 : vector<4x256xf32>
    %cst_37 = arith.constant 5.000000e-01 : f32
    %90 = vector.broadcast %cst_37 : f32 to vector<4x256xf32>
    %91 = arith.addf %89, %90 : vector<4x256xf32>
    %92 = arith.mulf %84, %91 : vector<4x256xf32>
    %93 = arith.addf %92, %15 : vector<4x256xf32>
    %94 = tpu.concatenate %93, %28 in 0 : vector<4x256xf32>, vector<4x256xf32> -> vector<8x256xf32>
    %c0_38 = arith.constant 0 : index
    %c0_39 = arith.constant 0 : index
    %95 = vector.load %arg12[%c0_38, %c0_39] : memref<8x8xf32, #tpu.memory_space<vmem>>, vector<8x8xf32>
    %cst_40 = arith.constant dense<0.000000e+00> : vector<8x256xf32>
    %96 = tpu.matmul %95, %94, %cst_40 {dimension_numbers = #tpu.dot_dimension_numbers<[1], [0], [0], [1], [0, 0, 1, 1], [], []>} : vector<8x8xf32>, vector<8x256xf32>, vector<8x256xf32> -> vector<8x256xf32>
    %c0_41 = arith.constant 0 : index
    %c0_42 = arith.constant 0 : index
    %97 = vector.load %arg13[%c0_41, %c0_42] : memref<8x1xf32, #tpu.memory_space<vmem>>, vector<8x1xf32>
    %98 = vector.broadcast %97 : vector<8x1xf32> to vector<8x256xf32>
    %99 = arith.addf %96, %98 : vector<8x256xf32>
    %cst_43 = arith.constant 5.000000e-01 : f32
    %100 = vector.broadcast %cst_43 : f32 to vector<8x256xf32>
    %101 = arith.mulf %100, %99 : vector<8x256xf32>
    %102 = math.tanh %101 : vector<8x256xf32>
    %cst_44 = arith.constant 5.000000e-01 : f32
    %103 = vector.broadcast %cst_44 : f32 to vector<8x256xf32>
    %104 = arith.mulf %103, %102 : vector<8x256xf32>
    %cst_45 = arith.constant 5.000000e-01 : f32
    %105 = vector.broadcast %cst_45 : f32 to vector<8x256xf32>
    %106 = arith.addf %104, %105 : vector<8x256xf32>
    %107 = arith.mulf %99, %106 : vector<8x256xf32>
    %c0_46 = arith.constant 0 : index
    %c0_47 = arith.constant 0 : index
    %c0_48 = arith.constant 0 : index
    %108 = vector.load %arg14[%c0_46, %c0_47, %c0_48] : memref<1x8x256xf32, #tpu.memory_space<vmem>>, vector<1x8x256xf32>
    %109 = vector.shape_cast %108 : vector<1x8x256xf32> to vector<8x256xf32>
    %110 = vector.shape_cast %107 : vector<8x256xf32> to vector<1x8x256xf32>
    tpu.vector_store %arg14[%c0_46, %c0_47, %c0_48], %110 {strides = array<i32>} : memref<1x8x256xf32, #tpu.memory_space<vmem>>, vector<1x8x256xf32>,
    return
  }
  func.func @transform_0(%arg0: i32) -> (i32, i32, i32) {
    %c0_i32 = arith.constant 0 : i32
    %c0_i32_0 = arith.constant 0 : i32
    %c0_i32_1 = arith.constant 0 : i32
    return %arg0, %c0_i32, %c0_i32_0 : i32, i32, i32
  }
  func.func @transform_1(%arg0: i32) -> (i32, i32) {
    %c0_i32 = arith.constant 0 : i32
    %c0_i32_0 = arith.constant 0 : i32
    %c0_i32_1 = arith.constant 0 : i32
    return %c0_i32, %c0_i32_0 : i32, i32
  }
  func.func @transform_2(%arg0: i32) -> (i32, i32) {
    %c0_i32 = arith.constant 0 : i32
    %c0_i32_0 = arith.constant 0 : i32
    %c0_i32_1 = arith.constant 0 : i32
    return %c0_i32, %c0_i32_0 : i32, i32
  }
  func.func @transform_3(%arg0: i32) -> (i32, i32) {
    %c0_i32 = arith.constant 0 : i32
    %c0_i32_0 = arith.constant 0 : i32
    %c0_i32_1 = arith.constant 0 : i32
    return %c0_i32, %c0_i32_0 : i32, i32
  }
  func.func @transform_4(%arg0: i32) -> (i32, i32) {
    %c0_i32 = arith.constant 0 : i32
    %c0_i32_0 = arith.constant 0 : i32
    %c0_i32_1 = arith.constant 0 : i32
    return %c0_i32, %c0_i32_0 : i32, i32
  }
  func.func @transform_5(%arg0: i32) -> (i32, i32) {
    %c0_i32 = arith.constant 0 : i32
    %c0_i32_0 = arith.constant 0 : i32
    %c0_i32_1 = arith.constant 0 : i32
    return %c0_i32, %c0_i32_0 : i32, i32
  }
  func.func @transform_6(%arg0: i32) -> (i32, i32) {
    %c0_i32 = arith.constant 0 : i32
    %c0_i32_0 = arith.constant 0 : i32
    %c0_i32_1 = arith.constant 0 : i32
    return %c0_i32, %c0_i32_0 : i32, i32
  }
  func.func @transform_7(%arg0: i32) -> (i32, i32) {
    %c0_i32 = arith.constant 0 : i32
    %c0_i32_0 = arith.constant 0 : i32
    %c0_i32_1 = arith.constant 0 : i32
    return %c0_i32, %c0_i32_0 : i32, i32
  }
  func.func @transform_8(%arg0: i32) -> (i32, i32) {
    %c0_i32 = arith.constant 0 : i32
    %c0_i32_0 = arith.constant 0 : i32
    %c0_i32_1 = arith.constant 0 : i32
    return %c0_i32, %c0_i32_0 : i32, i32
  }
  func.func @transform_9(%arg0: i32) -> (i32, i32) {
    %c0_i32 = arith.constant 0 : i32
    %c0_i32_0 = arith.constant 0 : i32
    %c0_i32_1 = arith.constant 0 : i32
    return %c0_i32, %c0_i32_0 : i32, i32
  }
  func.func @transform_10(%arg0: i32) -> (i32, i32) {
    %c0_i32 = arith.constant 0 : i32
    %c0_i32_0 = arith.constant 0 : i32
    %c0_i32_1 = arith.constant 0 : i32
    return %c0_i32, %c0_i32_0 : i32, i32
  }
  func.func @transform_11(%arg0: i32) -> (i32, i32) {
    %c0_i32 = arith.constant 0 : i32
    %c0_i32_0 = arith.constant 0 : i32
    %c0_i32_1 = arith.constant 0 : i32
    return %c0_i32, %c0_i32_0 : i32, i32
  }
  func.func @transform_12(%arg0: i32) -> (i32, i32) {
    %c0_i32 = arith.constant 0 : i32
    %c0_i32_0 = arith.constant 0 : i32
    %c0_i32_1 = arith.constant 0 : i32
    return %c0_i32, %c0_i32_0 : i32, i32
  }
  func.func @transform_13(%arg0: i32) -> (i32, i32, i32) {
    %c0_i32 = arith.constant 0 : i32
    %c0_i32_0 = arith.constant 0 : i32
    %c0_i32_1 = arith.constant 0 : i32
    return %arg0, %c0_i32, %c0_i32_0 : i32, i32, i32
  }
}

</mosaic_0001>

<bundles_post_ra>
// kernel: fasternext_forward.1
= control target key start
LH: loop header
LB: loop body
LE: loop exit
PB: predicated region body
PF: predicated region fallthrough
CT: control target
= control target key end

     0   :  { %s1415_s25 = smov 0   ;;  %s1595_s0 = inlined_call_operand.vmem [shape: f32[2,8,256], index: 0, kind: input, shape index: {}]   ;;  %s1596_s1 = inlined_call_operand.vmem [shape: f32[9,256], index: 1, kind: input, shape index: {}]   ;;  %s1597_s2 = inlined_call_operand.vmem [shape: f32[4,8], index: 2, kind: input, shape index: {}]   ;;  %s1598_s3 = inlined_call_operand.vmem [shape: f32[4,1], index: 3, kind: input, shape index: {}]   ;;  %s1599_s4 = inlined_call_operand.vmem [shape: f32[4,8], index: 4, kind: input, shape index: {}]   ;;  %s1600_s5 = inlined_call_operand.vmem [shape: f32[4,1], index: 5, kind: input, shape index: {}]   ;;  %s1601_s6 = inlined_call_operand.vmem [shape: f32[2,18], index: 6, kind: input, shape index: {}]   ;;  %s1602_s7 = inlined_call_operand.vmem [shape: f32[4,4], index: 7, kind: input, shape index: {}]   ;;  %s1603_s8 = inlined_call_operand.vmem [shape: f32[4,1], index: 8, kind: input, shape index: {}]   ;;  %s1604_s9 = inlined_call_operand.vmem [shape: f32[4,4], index: 9, kind: input, shape index: {}]   ;;  %s1605_s10 = inlined_call_operand.vmem [shape: f32[4,1], index: 10, kind: input, shape index: {}]   ;;  %s1606_s11 = inlined_call_operand.vmem [shape: f32[8,8], index: 11, kind: input, shape index: {}]   ;;  %s1607_s12 = inlined_call_operand.vmem [shape: f32[8,1], index: 12, kind: input, shape index: {}]   ;;  %s1608_s13 = inlined_call_operand.vmem [shape: f32[2,8,256], index: 13, kind: output, shape index: {}]  }
   0x1 LB: > { %s1256_s26 = sadd.s32 4294967295, %s1333_s25   ;;  %p1260_p0 = scmp.ge.s32.totalorder %s1333_s25, 1  ;;  %s1333_s25 = sphi %s1415_s25, %s23_s25  }
   0x2   : > { %p387_p1 = scmp.lt.s32.totalorder %s1333_s25, 3 }
   0x4   : > { %p388_p2 = pnand %p1260_p0, %p387_p1 }
   0x5   : > { %p431_p3 = scmp.lt.s32.totalorder (!%p388_p2), %s1256_s26, 1  ;;  %v1335_v0 = vmov (!%p388_p2), 0.0   ;;  %v1336_v1 = vmov (!%p388_p2), 0   ;;  %v448_v2 = vld [vmem:[%s1598_s3] sm:$0xf] (!%p388_p2)  ;;  %vm454_vm0 = vcmask (!%p388_p2), 64512   ;;  %v634_v26 = vlaneseq (!%p388_p2) }
   0x6   : > { %391 = sbr.rel (%p388_p2) target bundleno = 1331 (0x533), region = 72  ;;  %522 = vmatprep.mubr.f32.mxu0 (!%p388_p2), %v1335_v0  ;;  %1305 = vset.pattern.permute.xlu0 (!%p388_p2), %v1336_v1  ;;  %v447_v3 = vld [vmem:[%s1597_s2] sm:$0xf] (!%p388_p2)  ;;  %s1337_s20 = smov (!%p388_p2), 127   ;;  %v444_v35 = vld [vmem:[%s1596_s1 + $0x8] sm:$0xff] (!%p388_p2)  ;;  %vm804_vm6 = vcmask (!%p388_p2), 1041408  }
   0x7   : > { %451 = vperm.xlu0 (!%p388_p2), %1305, %v448_v2   ;;  %613 = vmatprep.mubr.f32.mxu1 (!%p388_p2), %v1335_v0  ;;  %v539_v6 = vld [vmem:[%s1599_s4] sm:$0xf] (!%p388_p2)  ;;  %s1338_s21 = smov (!%p388_p2), 16   ;;  %s1339_s22 = smov (!%p388_p2), 15   ;;  %v640_v29 = vshrl.u32 (!%p388_p2), %v634_v26, 7  ;;  %v1478_v32 = vand.u32 (!%p388_p2), 127, %v634_v26 }
   0x8   : > { %1306 = vset.pattern.permute.xlu1 (!%p388_p2), %v1336_v1  ;;  %s1340_s23 = smov (!%p388_p2), 113   ;;  %s1341_s24 = smov (!%p388_p2), 17   ;;  %v540_v24 = vld [vmem:[%s1600_s5] sm:$0xf] (!%p388_p2)  ;;  %vm807_vm9 = vcmask (!%p388_p2), 1043456   ;;  %vm810_vm10 = vcmask (!%p388_p2), 1045504  }
   0x9   : > { %s1342_s27 = smov (!%p388_p2), 1   ;;  %s1343_s28 = smov (!%p388_p2), 112   ;;  %v1109_v25 = vld [vmem:[%s1607_s12] sm:$0xff] (!%p388_p2)  ;;  %v709_v33 = vsub.s32 (!%p388_p2), 5, %v640_v29  ;;  %v675_v37 = vsub.s32 (!%p388_p2), 2, %v640_v29  ;;  %v726_v39 = vsub.s32 (!%p388_p2), 6, %v640_v29 }
   0xa   : > { %s1344_s30 = smov (!%p388_p2), 111   ;;  %v443_v34 = vld [vmem:[%s1596_s1] sm:$0xff] (!%p388_p2)  ;;  %v641_v40 = vsub.s32 (!%p388_p2), 0, %v640_v29  ;;  %vm704_vm1 = vcmp.lt.s32.totalorder (!%p388_p2), %v1478_v32, 127  ;;  %v658_v43 = vsub.s32 (!%p388_p2), 1, %v640_v29  ;;  %vm670_vm2 = vcmp.lt.s32.totalorder (!%p388_p2), %v1478_v32, 15 }
   0xb   : > { %v710_v41 = vrot.slane (!%p388_p2), %v443_v34, %v709_v33  ;;  %v714_v42 = vrot.slane (!%p388_p2), %v444_v35, %v709_v33  ;;  %v676_v44 = vrot.slane (!%p388_p2), %v443_v34, %v675_v37  ;;  %v680_v45 = vrot.slane (!%p388_p2), %v444_v35, %v675_v37 }
   0xc   : > { %v692_v48 = vsub.s32 (!%p388_p2), 3, %v640_v29  ;;  %vm721_vm3 = vcmp.lt.s32.totalorder (!%p388_p2), %v1478_v32, 113  ;;  %v727_v49 = vrot.slane (!%p388_p2), %v443_v34, %v726_v39  ;;  %v731_v50 = vrot.slane (!%p388_p2), %v444_v35, %v726_v39 }
   0xd   : > { %s1610_s26 = smov (!%p431_p3, %s1256_s26), 1  ;;  %vm636_vm4 = vcmp.lt.s32.totalorder %v1478_v32, 17  ;;  %v642_v51 = vrot.slane %v443_v34, %v641_v40  ;;  %v646_v52 = vrot.slane %v444_v35, %v641_v40  ;;  %vm653_vm5 = vcmp.lt.s32.totalorder %v1478_v32, 16 }
   0xe   : > { %s1281_s29 = sshll.u32 %s1610_s26, 4  ;;  %v743_v53 = vsub.s32 7, %v640_v29  ;;  %v659_v56 = vrot.slane %v443_v34, %v658_v43  ;;  %v663_v57 = vrot.slane %v444_v35, %v658_v43  ;;  %vm687_vm7 = vcmp.lt.s32.totalorder %v1478_v32, 1 }
   0xf   : > { %s435_s15 = scalar_lea.vmem %s1595_s0, %s1281_s29  ;;  %v693_v62 = vrot.slane %v443_v34, %v692_v48  ;;  %v697_v2 = vrot.slane %v444_v35, %v692_v48  ;;  %vm738_vm8 = vcmp.lt.s32.totalorder %v1478_v32, 112  ;;  %vm755_vm11 = vcmp.lt.s32.totalorder %v1478_v32, 111  ;;  %v904_v32 = vld [vmem:[%s1603_s8] sm:$0xf] }
  0x10   : > { %v442_v4 = vld [vmem:[%s435_s15 + $0x8] sm:$0xff]  ;;  %v441_v5 = vld [vmem:[%s435_s15] sm:$0xff]  ;;  %vm820_vm12 = vcmask 146432   ;;  %vm910_vm13 = vcmask 31744  }
  0x11   : > { %458 = vmatprep.subr.mxu0 %v442_v4  ;;  %549 = vmatprep.subr.mxu1 %v442_v4 }
  0x12   : > { %459 = vmatpush1.msra.mxu0 %v441_v5  ;;  %550 = vmatpush1.msra.mxu1 %v441_v5  ;;  %v744_v5 = vrot.slane %v443_v34, %v743_v53 }
  0x13   : > { %1265 = vmatmul.mubr.msk.f32.vlgmr.msra.gmra.mrb[0].mxu0 %vm454_vm0, %v447_v3  ;;  %1266 = vmatmul.mubr.msk.f32.vlgmr.msra.gmra.mrb[0].mxu1 %vm454_vm0, %v539_v6  ;;  %v748_v6 = vrot.slane %v444_v35, %v743_v53 }
  0x14   : > { %894 = vmatprep.mubr.f32.mxu0 %v1335_v0  ;;  %984 = vmatprep.mubr.f32.mxu1 %v1335_v0 }
  0x86   : > { %v452_v7 = vpop.permute.xlu0 %451 }
  0xe6   : > { %v524_v8 = vpop.f32.mrb[0].mxu0  ;;  %v1464_v22 = vpop.f32.mrb[0].mxu1 }
  0xe7   : > { %v525_v9 = vadd.f32 %v524_v8, %v452_v7  ;;  %v526_v10 = vpop.f32.mrb[1].mxu0  ;;  %v1466_v23 = vpop.f32.mrb[1].mxu1 }
  0xe8   : > { %v527_v11 = vadd.f32 %v526_v10, %v452_v7 }
  0xe9   : > { %v529_v12 = vmul.f32 0.5, %v525_v9 }
  0xea   : > { %v530_v13 = vmul.f32 0.5, %v527_v11 }
  0xeb   : > { %1307 = vtanh.f32 %v529_v12 }
  0xec   : > { %1309 = vtanh.f32 %v530_v13 }
  0xf5   : > { %v1308_v14 = vpop.eup %1307 }
  0xf6   : > { %v1310_v15 = vpop.eup %1309  ;;  %v533_v16 = vmul.f32 0.5, %v1308_v14 }
  0xf7   : > { %v534_v17 = vmul.f32 0.5, %v1310_v15 }
  0xf8   : > { %v535_v18 = vadd.f32 0.5, %v533_v16 }
  0xf9   : > { %v536_v20 = vadd.f32 0.5, %v534_v17 }
  0xfa   : > { %v1446_v19 = vmul.f32 %v535_v18, %v525_v9 }
  0xfb   : > { %v1450_v21 = vmul.f32 %v536_v20, %v527_v11 }
  0xfc   : > { %700 = vrot.lane.b32.xlu1 %v1446_v19, %s1337_s20  ;;  %649 = vrot.lane.b32.xlu0 %v1446_v19, %s1338_s21 }
 0x100   : > { %666 = vrot.lane.b32.xlu1 %v1446_v19, %s1339_s22  ;;  %702 = vrot.lane.b32.xlu0 %v1450_v21, %s1337_s20 }
 0x104   : > { %717 = vrot.lane.b32.xlu1 %v1446_v19, %s1340_s23  ;;  %668 = vrot.lane.b32.xlu0 %v1450_v21, %s1339_s22 }
 0x108   : > { %630 = vrot.lane.b32.xlu1 %v1446_v19, %s1341_s24  ;;  %719 = vrot.lane.b32.xlu0 %v1450_v21, %s1340_s23 }
 0x10c   : > { %683 = vrot.lane.b32.xlu1 %v1446_v19, %s1342_s27  ;;  %632 = vrot.lane.b32.xlu0 %v1450_v21, %s1341_s24 }
 0x110   : > { %651 = vrot.lane.b32.xlu1 %v1450_v21, %s1338_s21  ;;  %685 = vrot.lane.b32.xlu0 %v1450_v21, %s1342_s27 }
 0x114   : > { %734 = vrot.lane.b32.xlu1 %v1446_v19, %s1343_s28  ;;  %736 = vrot.lane.b32.xlu0 %v1450_v21, %s1343_s28  ;;  %s440_s28 = scalar_lea.vmem %s1608_s13, %s1281_s29 }
 0x118   : > { %751 = vrot.lane.b32.xlu1 %v1446_v19, %s1344_s30  ;;  %753 = vrot.lane.b32.xlu0 %v1450_v21, %s1344_s30 }
 0x11c   : > { %543 = vperm.xlu0 %1305, %v540_v24   ;;  %907 = vperm.xlu1 %1306, %v904_v32  }
 0x120   : > { %1112 = vperm.xlu0 %1305, %v1109_v25  }
 0x16e   : > { %v701_v27 = vpop.permute.xlu1 %700  ;;  %v1476_v28 = vpop.permute.xlu0 %649 }
 0x172   : > { %v667_v30 = vpop.permute.xlu1 %666  ;;  %v703_v31 = vpop.permute.xlu0 %702 }
 0x173   : > { %v705_v54 = vsel %vm704_vm1, %v701_v27, %v703_v31  ;;  %v706_v55 = vsel %vm704_vm1, %v703_v31, %v701_v27 }
 0x174   : > { %v715_v3 = vmul.f32 %v710_v41, %v705_v54  ;;  %v716_v4 = vmul.f32 %v714_v42, %v706_v55 }
 0x176   : > { %v718_v36 = vpop.permute.xlu1 %717  ;;  %v669_v38 = vpop.permute.xlu0 %668  ;;  %v788_v20 = vrot.slane %v715_v3, 6  ;;  %v789_v24 = vrot.slane %v716_v4, 6  ;;  %v1267_v3 = vld [vmem:[%s1596_s1 + $0x10] ss:$0 sm:$0xff] }
 0x177   : > { %v671_v58 = vsel %vm670_vm2, %v667_v30, %v669_v38  ;;  %v672_v59 = vsel %vm670_vm2, %v669_v38, %v667_v30 }
 0x178   : > { %v681_v7 = vmul.f32 %v676_v44, %v672_v59  ;;  %v682_v8 = vmul.f32 %v680_v45, %v671_v58 }
 0x17a   : > { %v631_v46 = vpop.permute.xlu1 %630  ;;  %v720_v47 = vpop.permute.xlu0 %719  ;;  %v776_v27 = vrot.slane %v681_v7, 4  ;;  %v777_v29 = vrot.slane %v682_v8, 4  ;;  %v819_v7 = vld [vmem:[%s1601_s6] sm:$0x3] }
 0x17b   : > { %v722_v63 = vsel %vm721_vm3, %v718_v36, %v720_v47  ;;  %v723_v1 = vsel %vm721_vm3, %v720_v47, %v718_v36  ;;  %v1002_v8 = vld [vmem:[%s1605_s10] sm:$0xf] }
 0x17c   : > { %v732_v9 = vmul.f32 %v727_v49, %v722_v63  ;;  %v733_v10 = vmul.f32 %v731_v50, %v723_v1  ;;  %v814_v50 = vsel %vm804_vm6, %v1450_v21, %v789_v24  ;;  %1005 = vperm.xlu1 %1306, %v1002_v8  }
 0x17e   : > { %v684_v60 = vpop.permute.xlu1 %683  ;;  %v633_v61 = vpop.permute.xlu0 %632  ;;  %v794_v38 = vrot.slane %v732_v9, 4  ;;  %v795_v39 = vrot.slane %v733_v10, 4 }
 0x17f   : > { %v637_v11 = vsel %vm636_vm4, %v631_v46, %v633_v61  ;;  %v638_v12 = vsel %vm636_vm4, %v633_v61, %v631_v46  ;;  %v813_v46 = vsel %vm804_vm6, %v1446_v19, %v788_v20 }
 0x180   : > { %v647_v30 = vmul.f32 %v642_v51, %v638_v12  ;;  %v648_v33 = vmul.f32 %v646_v52, %v637_v11  ;;  %v816_v58 = vsel %vm807_vm9, %v814_v50, %v795_v39  ;;  %v903_v12 = vld [vmem:[%s1602_s7] sm:$0xf] }
 0x182   : > { %v652_v13 = vpop.permute.xlu1 %651  ;;  %v686_v14 = vpop.permute.xlu0 %685 }
 0x183   : > { %v654_v15 = vsel %vm653_vm5, %v1476_v28, %v652_v13  ;;  %v655_v16 = vsel %vm653_vm5, %v652_v13, %v1476_v28  ;;  %v688_v17 = vsel %vm687_vm7, %v684_v60, %v686_v14  ;;  %v689_v18 = vsel %vm687_vm7, %v686_v14, %v684_v60  ;;  %v1268_v60 = vld [vmem:[%s1596_s1 + $0x18] ss:$0 sm:$0xff] }
 0x184   : > { %v664_v25 = vmul.f32 %v659_v56, %v655_v16  ;;  %v665_v26 = vmul.f32 %v663_v57, %v654_v15  ;;  %v698_v31 = vmul.f32 %v693_v62, %v689_v18  ;;  %v699_v36 = vmul.f32 %v697_v2, %v688_v17 }
 0x185   : > { %v815_v56 = vsel %vm807_vm9, %v813_v46, %v794_v38 }
 0x186   : > { %v770_v34 = vrot.slane %v664_v25, 6  ;;  %v771_v35 = vrot.slane %v665_v26, 6  ;;  %v735_v37 = vpop.permute.xlu1 %734  ;;  %v737_v28 = vpop.permute.xlu0 %736  ;;  %v782_v48 = vrot.slane %v698_v31, 2  ;;  %v783_v51 = vrot.slane %v699_v36, 2 }
 0x187   : > { %v739_v40 = vsel %vm738_vm8, %v735_v37, %v737_v28  ;;  %v740_v41 = vsel %vm738_vm8, %v737_v28, %v735_v37 }
 0x188   : > { %v805_v42 = vsel %vm804_vm6, %v647_v30, %v770_v34  ;;  %v806_v43 = vsel %vm804_vm6, %v648_v33, %v771_v35  ;;  %v749_v44 = vmul.f32 %v744_v5, %v739_v40  ;;  %v750_v45 = vmul.f32 %v748_v6, %v740_v41 }
 0x189   : > { %v808_v47 = vsel %vm807_vm9, %v805_v42, %v776_v27  ;;  %v809_v49 = vsel %vm807_vm9, %v806_v43, %v777_v29 }
 0x18a   : > { %v800_v52 = vrot.slane %v749_v44, 2  ;;  %v801_v53 = vrot.slane %v750_v45, 2  ;;  %v752_v54 = vpop.permute.xlu1 %751  ;;  %v754_v55 = vpop.permute.xlu0 %753  ;;  %v811_v57 = vsel %vm810_vm10, %v808_v47, %v782_v48  ;;  %v812_v62 = vsel %vm810_vm10, %v809_v49, %v783_v51 }
 0x18b   : > { %v757_v61 = vsel %vm755_vm11, %v754_v55, %v752_v54  ;;  %v756_v4 = vsel %vm755_vm11, %v752_v54, %v754_v55 }
 0x18c   : > { %v817_v59 = vsel %vm810_vm10, %v815_v56, %v800_v52  ;;  %v818_v63 = vsel %vm810_vm10, %v816_v58, %v801_v53  ;;  %v767_v5 = vmul.f32 %v1268_v60, %v757_v61  ;;  %v766_v6 = vmul.f32 %v1267_v3, %v756_v4  ;;  %v1108_v3 = vld [vmem:[%s1606_s11] sm:$0xff] }
 0x18d   : > { %v1283_v1 = vpack.c.bf16 %v818_v63, %v812_v62  ;;  %v1285_v2 = vpack.c.bf16 %v817_v59, %v811_v57 }
 0x18f   : > { %1284 = vmatprep.subr.bf16.mxu0 %v1283_v1 }
 0x190   : > { %1286 = vmatpush1.bf16.msra.mxu0 %v1285_v2 }
 0x191   : > { %1269 = vmatprep.subr.msk.mxu0 %vm804_vm6, %v767_v5 }
 0x194   : > { %1270 = vmatpush1.msk.msra.mxu0 %vm804_vm6, %v766_v6 }
 0x195   : > { %1271 = vmatmul.mubr.msk.f32.vlgmr.msra.gmra.mrb[2].mxu0 %vm820_vm12, %v819_v7 }
 0x196   : > { %1182 = vmatprep.mubr.f32.mxu0 %v1335_v0 }
 0x19b   : > { %v908_v14 = vpop.permute.xlu1 %907  ;;  %v544_v35 = vpop.permute.xlu0 %543 }
 0x19c   : > { %v616_v36 = vadd.f32 %v1464_v22, %v544_v35  ;;  %v618_v37 = vadd.f32 %v1466_v23, %v544_v35 }
 0x19e   : > { %v620_v28 = vmul.f32 0.5, %v616_v36  ;;  %v621_v38 = vmul.f32 0.5, %v618_v37 }
 0x19f   : > { %v1113_v4 = vpop.permute.xlu0 %1112 }
 0x1fb   : > { %v1006_v39 = vpop.permute.xlu1 %1005 }
 0x268   : > { %v896_v9 = vpop.f32.mrb[2].mxu0 }
 0x269   : > { %v898_v10 = vpop.f32.mrb[3].mxu0  ;;  %v901_v13 = vsel %vm804_vm6, %v896_v9, %v1446_v19 }
 0x26a   : > { %v902_v11 = vsel %vm804_vm6, %v898_v10, %v1450_v21 }
 0x26b   : > { %1272 = vmatprep.subr.msk.mxu1 %vm807_vm9, %v902_v11 }
 0x26c   : > { %1273 = vmatpush1.msk.msra.mxu1 %vm807_vm9, %v901_v13 }
 0x26d   : > { %1274 = vmatmul.mubr.msk.f32.vlgmr.msra.gmra.mrb[2].mxu1 %vm910_vm13, %v903_v12 }
 0x26e   : > { %1081 = vmatprep.mubr.f32.mxu1 %v1335_v0  ;;  %v1001_v0 = vld [vmem:[%s1604_s9] sm:$0xf] }
 0x340   : > { %v986_v15 = vpop.f32.mrb[2].mxu1 }
 0x341   : > { %v987_v16 = vadd.f32 %v986_v15, %v908_v14  ;;  %v988_v17 = vpop.f32.mrb[3].mxu1 }
 0x342   : > { %v989_v18 = vadd.f32 %v988_v17, %v908_v14 }
 0x343   : > { %v991_v20 = vmul.f32 0.5, %v987_v16 }
 0x344   : > { %v992_v24 = vmul.f32 0.5, %v989_v18 }
 0x345   : > { %1311 = vtanh.f32 %v991_v20 }
 0x346   : > { %1313 = vtanh.f32 %v992_v24 }
 0x347   : > { %1315 = vtanh.f32 %v620_v28 }
 0x348   : > { %1317 = vtanh.f32 %v621_v38 }
 0x34f   : > { %v1312_v25 = vpop.eup %1311 }
 0x350   : > { %v1314_v26 = vpop.eup %1313  ;;  %v995_v27 = vmul.f32 0.5, %v1312_v25 }
 0x351   : > { %v996_v29 = vmul.f32 0.5, %v1314_v26  ;;  %v1316_v46 = vpop.eup %1315 }
 0x352   : > { %v997_v30 = vadd.f32 0.5, %v995_v27  ;;  %v1318_v47 = vpop.eup %1317  ;;  %v624_v48 = vmul.f32 0.5, %v1316_v46 }
 0x353   : > { %v998_v31 = vadd.f32 0.5, %v996_v29  ;;  %v625_v49 = vmul.f32 0.5, %v1318_v47 }
 0x354   : > { %v999_v34 = vmul.f32 %v997_v30, %v987_v16  ;;  %v626_v22 = vadd.f32 0.5, %v624_v48 }
 0x355   : > { %v1000_v33 = vmul.f32 %v998_v31, %v989_v18  ;;  %v627_v23 = vadd.f32 0.5, %v625_v49 }
 0x356   : > { %v628_v54 = vmul.f32 %v626_v22, %v616_v36 }
 0x357   : > { %1275 = vmatprep.subr.msk.mxu1 %vm807_vm9, %v1000_v33  ;;  %v629_v56 = vmul.f32 %v627_v23, %v618_v37 }
 0x358   : > { %1276 = vmatpush1.msk.msra.mxu1 %vm807_vm9, %v999_v34  ;;  %v1102_v60 = vrot.slane %v628_v54, 4 }
 0x359   : > { %1277 = vmatmul.mubr.msk.f32.vlgmr.msra.gmra.mrb[4].mxu1 %vm910_vm13, %v1001_v0  ;;  %v1103_v62 = vrot.slane %v629_v56, 4 }
 0x42c   : > { %v1083_v40 = vpop.f32.mrb[4].mxu1 }
 0x42d   : > { %v1084_v41 = vadd.f32 %v1083_v40, %v1006_v39  ;;  %v1085_v42 = vpop.f32.mrb[5].mxu1 }
 0x42e   : > { %v1086_v43 = vadd.f32 %v1085_v42, %v1006_v39 }
 0x42f   : > { %v1088_v44 = vmul.f32 0.5, %v1084_v41 }
 0x430   : > { %v1089_v45 = vmul.f32 0.5, %v1086_v43 }
 0x431   : > { %1319 = vtanh.f32 %v1088_v44 }
 0x432   : > { %1321 = vtanh.f32 %v1089_v45 }
 0x43b   : > { %v1320_v50 = vpop.eup %1319 }
 0x43c   : > { %v1322_v51 = vpop.eup %1321  ;;  %v1092_v52 = vmul.f32 0.5, %v1320_v50 }
 0x43d   : > { %v1093_v53 = vmul.f32 0.5, %v1322_v51 }
 0x43e   : > { %v1094_v55 = vadd.f32 0.5, %v1092_v52 }
 0x43f   : > { %v1095_v57 = vadd.f32 0.5, %v1093_v53 }
 0x440   : > { %v1096_v58 = vmul.f32 %v1094_v55, %v1084_v41 }
 0x441   : > { %v1097_v59 = vmul.f32 %v1095_v57, %v1086_v43 }
 0x442   : > { %v1098_v61 = vadd.f32 %v1096_v58, %v1446_v19 }
 0x443   : > { %v1099_v63 = vadd.f32 %v1097_v59, %v1450_v21 }
 0x444   : > { %v1106_v1 = vsel %vm807_vm9, %v1098_v61, %v1102_v60 }
 0x445   : > { %v1107_v2 = vsel %vm807_vm9, %v1099_v63, %v1103_v62 }
 0x446   : > { %1118 = vmatprep.subr.mxu0 %v1107_v2 }
 0x447   : > { %1119 = vmatpush1.msra.mxu0 %v1106_v1 }
 0x448   : > { %1278 = vmatmul.mubr.msk.f32.vlgmr.msra.gmra.mrb[4].mxu0 %vm454_vm0, %v1108_v3 }
 0x51b   : > { %v1184_v5 = vpop.f32.mrb[4].mxu0 }
 0x51c   : > { %v1185_v6 = vadd.f32 %v1184_v5, %v1113_v4  ;;  %v1186_v19 = vpop.f32.mrb[5].mxu0 }
 0x51d   : > { %v1187_v7 = vadd.f32 %v1186_v19, %v1113_v4 }
 0x51e   : > { %v1189_v32 = vmul.f32 0.5, %v1185_v6 }
 0x51f   : > { %v1190_v21 = vmul.f32 0.5, %v1187_v7 }
 0x520   : > { %1323 = vtanh.f32 %v1189_v32 }
 0x521   : > { %1325 = vtanh.f32 %v1190_v21 }
 0x52a   : > { %v1324_v8 = vpop.eup %1323 }
 0x52b   : > { %v1326_v9 = vpop.eup %1325  ;;  %v1193_v10 = vmul.f32 0.5, %v1324_v8 }
 0x52c   : > { %v1194_v11 = vmul.f32 0.5, %v1326_v9 }
 0x52d   : > { %v1195_v12 = vadd.f32 0.5, %v1193_v10 }
 0x52e   : > { %v1196_v13 = vadd.f32 0.5, %v1194_v11 }
 0x52f   : > { %v1197_v14 = vmul.f32 %v1195_v12, %v1185_v6 }
 0x530   : > { %v1198_v15 = vmul.f32 %v1196_v13, %v1187_v7 }
 0x531   : > { %1199 = vst [vmem:[%s440_s28] sm:$0xff] %v1197_v14 }
 0x532   : > { %1200 = vst [vmem:[%s440_s28 + $0x8] sm:$0xff] %v1198_v15 }
 0x533 PF: > { %s23_s25 = sadd.s32 1, %s1333_s25  }
 0x534   : > { %p20_p4 = scmp.ge.s32.totalorder %s23_s25, 4  }
 0x536   :  { %22 = sbr.rel (!%p20_p4) target bundleno = 1 (0x1), region = 102 }

</bundles_post_ra>
